<compile_context>
chip_gen: v5e
topology: v5e:2x2
jax: 0.10.0
libtpu: 0.0.40
codegen_flags: <defaults>
</compile_context>

<pallas_src>
import functools

import jax
import jax.numpy as jnp
from jax.experimental import pallas as pl
from jax.experimental.pallas import tpu as pltpu


_NEG_INF = -1e30  # finite "minus infinity" for the running softmax max


def _flash_attn_kernel(q_ref, k_ref, v_ref, o_ref, m_sc, l_sc, acc_sc):
    """One (batch, head, q_tile, kv_tile) grid step.

    Blocks:
      q_ref : (1, 1, tq, d_pad)  projected, pre-scaled queries (resident across kv axis)
      k_ref : (1, 1, tk, d_pad)  projected keys
      v_ref : (1, 1, tk, d_pad)  projected values
      o_ref : (1, tq, d_pad)     normalized per-head context, written at the last kv step
    Scratch (persists across the kv reduction axis):
      m_sc (tq,1) running max; l_sc (tq,1) running denominator;
      acc_sc (tq,d_pad) unnormalized context (f32).
    """
    kv = pl.program_id(3)

    @pl.when(kv == 0)
    def _init():
        m_sc[...] = jnp.full(m_sc.shape, _NEG_INF, jnp.float32)
        l_sc[...] = jnp.zeros(l_sc.shape, jnp.float32)
        acc_sc[...] = jnp.zeros(acc_sc.shape, jnp.float32)

    q = q_ref[0, 0]                                   # (tq, d_pad)
    k = k_ref[0, 0]                                   # (tk, d_pad)
    v = v_ref[0, 0]                                   # (tk, d_pad)

    # Scores for this kv tile: (tq, tk).  bf16 MXU operands, f32 accumulation;
    # contraction runs over the full 128-wide (padded) head dimension.
    s = jax.lax.dot_general(q, k, (((1,), (1,)), ((), ())),
                            preferred_element_type=jnp.float32)

    # Online softmax (f32), unnormalized accumulation of the context.
    m_prev = m_sc[...]
    m_new = jnp.maximum(m_prev, jnp.max(s, axis=-1, keepdims=True))
    alpha = jnp.exp(m_prev - m_new)                   # rescale old partials
    p = jnp.exp(s - m_new)                            # (tq, tk)
    l_sc[...] = alpha * l_sc[...] + jnp.sum(p, axis=-1, keepdims=True)
    acc_sc[...] = alpha * acc_sc[...] + jnp.dot(
        p.astype(v.dtype), v, preferred_element_type=jnp.float32)
    m_sc[...] = m_new

    @pl.when(kv == pl.num_programs(3) - 1)
    def _finalize():
        # Normalize after the V matmul: per-row reciprocal on (tq, 1) via the EUP.
        inv_l = pl.reciprocal(l_sc[...], approx=True)
        o_ref[0] = (acc_sc[...] * inv_l).astype(o_ref.dtype)


def _device_kind():
    try:
        return jax.devices()[0].device_kind.lower()
    except Exception:
        return ""


def _gen_caps():
    """Generation-aware tile caps and VMEM budget cap."""
    kind = _device_kind()
    if "v7" in kind:
        # 64 MiB physical VMEM, 2 TCs, 256-wide MXU.
        return dict(tq_cap=256, tk_cap=256, tk_pref=256, vmem_cap=48 * 2 ** 20)
    if "v5 lite" in kind or "v5e" in kind or "v5litepod" in kind:
        # 128 MiB VMEM, 128-wide MXU, lowest HBM bandwidth -> big kv tiles.
        return dict(tq_cap=256, tk_cap=512, tk_pref=128, vmem_cap=96 * 2 ** 20)
    # v6e and default: 128 MiB VMEM, 256-wide MXU.
    return dict(tq_cap=256, tk_cap=512, tk_pref=256, vmem_cap=96 * 2 ** 20)


def _pick_tile(length, cap, pref):
    """Largest tile <= cap dividing `length`; prefer multiples of `pref`, then 128, then 8."""
    if length <= cap:
        return length
    for step in sorted({pref, 128, 8}, reverse=True):
        t = (cap // step) * step
        while t >= step:
            if length % t == 0:
                return t
            t -= step
    return length


def _vmem_limit_bytes(tq, tk, d_pad, itemsize, cap_bytes):
    # Double-buffered q/k/v/out tiles + f32 online-softmax scratch + score temporaries.
    tiles = 2 * itemsize * d_pad * (2 * tq + 2 * tk)
    scratch = 4 * tq * (d_pad + 2)
    work = 4 * 4 * tq * tk
    need = tiles + scratch + work
    return int(min(max(4 * need, 8 * 2 ** 20), cap_bytes))


def self_attention(value, key, query, params, *, embed_size, heads,
                   tq=None, tk=None, use_bf16=True):
    """value/key/query: (N, seq, embed_size) float32. Returns (N, q_len, embed_size) f32."""
    head_dim = embed_size // heads
    assert head_dim * heads == embed_size
    N, q_len, _ = query.shape
    _, k_len, _ = key.shape
    _, v_len, _ = value.shape
    assert k_len == v_len, "key/value lengths must match"

    caps = _gen_caps()
    if tq is None:
        tq = _pick_tile(q_len, caps["tq_cap"], 128)
    if tk is None:
        tk = _pick_tile(k_len, caps["tk_cap"], caps["tk_pref"])
    assert q_len % tq == 0 and k_len % tk == 0
    assert (tq % 8 == 0 or tq == q_len) and (tk % 8 == 0 or tk == k_len)

    # Pad head_dim up to a multiple of the 128-lane width for full MXU utilization.
    d_pad = -(-head_dim // 128) * 128
    mm_dtype = jnp.bfloat16 if use_bf16 else jnp.float32
    scale = 1.0 / (embed_size ** 0.5)

    def pad_w(w_t):  # (head_dim, head_dim) -> (head_dim, d_pad) with zero-padded columns
        if d_pad == head_dim:
            return w_t
        return jnp.pad(w_t, ((0, 0), (0, d_pad - head_dim)))

    # nn.Linear computes x @ W.T -> pass transposed weights; fold the softmax scale into Q.
    wq_t = pad_w(params['wq'].T * scale)
    wk_t = pad_w(params['wk'].T)
    wv_t = pad_w(params['wv'].T)

    # Projections hoisted out of the kv loop: one XLA GEMM per tensor, output requested
    # directly in head-major (N, heads, L, d_pad) layout, stored as bf16 for the kernel.
    def project(x, L, w_t):
        xh = x.reshape(N, L, heads, head_dim)
        return jnp.einsum('nlhd,de->nhle', xh, w_t).astype(mm_dtype)

    qp = project(query, q_len, wq_t)
    kp = project(key, k_len, wk_t)
    vp = project(value, v_len, wv_t)

    grid = (N, heads, q_len // tq, k_len // tk)

    ctx = pl.pallas_call(
        _flash_attn_kernel,
        out_shape=jax.ShapeDtypeStruct((N, q_len, heads * d_pad), mm_dtype),
        grid_spec=pltpu.PrefetchScalarGridSpec(
            num_scalar_prefetch=0,
            grid=grid,
            in_specs=[
                pl.BlockSpec((1, 1, tq, d_pad), lambda n, h, t, s: (n, h, t, 0)),
                pl.BlockSpec((1, 1, tk, d_pad), lambda n, h, t, s: (n, h, s, 0)),
                pl.BlockSpec((1, 1, tk, d_pad), lambda n, h, t, s: (n, h, s, 0)),
            ],
            # Each head writes a 128-aligned lane slice of the concatenated-heads output.
            out_specs=pl.BlockSpec((1, tq, d_pad), lambda n, h, t, s: (n, t, h)),
            scratch_shapes=[
                pltpu.VMEM((tq, 1), jnp.float32),       # running max
                pltpu.VMEM((tq, 1), jnp.float32),       # running denominator
                pltpu.VMEM((tq, d_pad), jnp.float32),   # unnormalized context
            ],
        ),
        compiler_params=pltpu.CompilerParams(
            dimension_semantics=("parallel", "parallel", "parallel", "arbitrary"),
            vmem_limit_bytes=_vmem_limit_bytes(tq, tk, d_pad,
                                               jnp.dtype(mm_dtype).itemsize,
                                               caps["vmem_cap"]),
        ),
    )(qp, kp, vp)

    # Output projection as a plain (N*Lq, heads*d_pad) @ (heads*d_pad, E) XLA GEMM.
    # wfc rows for padded lanes are zero, so the padded lanes contribute nothing.
    wfc_t = params['wfc'].T.reshape(heads, head_dim, embed_size)
    if d_pad != head_dim:
        wfc_t = jnp.pad(wfc_t, ((0, 0), (0, d_pad - head_dim), (0, 0)))
    wfc_packed = wfc_t.reshape(heads * d_pad, embed_size)
    out = jnp.dot(ctx.reshape(N * q_len, heads * d_pad), wfc_packed,
                  preferred_element_type=jnp.float32)
    return out.reshape(N, q_len, embed_size) + params['bfc']


def _reference(value, key, query, params, *, embed_size, heads):
    """Pure-JAX reference mirroring the PyTorch forward."""
    head_dim = embed_size // heads
    N, q_len, _ = query.shape
    v_len, k_len = value.shape[1], key.shape[1]
    values = value.reshape(N, v_len, heads, head_dim)
    keys = key.reshape(N, k_len, heads, head_dim)
    queries = query.reshape(N, q_len, heads, head_dim)
    values = jnp.einsum('nlhd,ed->nlhe', values, params['wv'])
    keys = jnp.einsum('nlhd,ed->nlhe', keys, params['wk'])
    queries = jnp.einsum('nlhd,ed->nlhe', queries, params['wq'])
    energy = jnp.einsum('nqhd,nkhd->nhqk', queries, keys)
    attention = jax.nn.softmax(energy / (embed_size ** 0.5), axis=3)
    out = jnp.einsum('nhql,nlhd->nqhd', attention, values)
    out = out.reshape(N, q_len, heads * head_dim)
    out = out @ params['wfc'].T + params['bfc']
    return out


if __name__ == "__main__":
    embed_size = 32
    heads = 4
    head_dim = embed_size // heads
    N = 2
    seq = 16  # small, but with tq=tk=8 it exercises both q- and kv-tiling

    key0 = jax.random.PRNGKey(0)
    ks = jax.random.split(key0, 8)

    value = jax.random.normal(ks[0], (N, seq, embed_size), dtype=jnp.float32)
    key_in = jax.random.normal(ks[1], (N, seq, embed_size), dtype=jnp.float32)
    query = jax.random.normal(ks[2], (N, seq, embed_size), dtype=jnp.float32)

    params = {
        'wq': 0.1 * jax.random.normal(ks[3], (head_dim, head_dim), dtype=jnp.float32),
        'wk': 0.1 * jax.random.normal(ks[4], (head_dim, head_dim), dtype=jnp.float32),
        'wv': 0.1 * jax.random.normal(ks[5], (head_dim, head_dim), dtype=jnp.float32),
        'wfc': 0.1 * jax.random.normal(ks[6], (embed_size, heads * head_dim), dtype=jnp.float32),
        'bfc': 0.1 * jax.random.normal(ks[7], (embed_size,), dtype=jnp.float32),
    }

    attn_fn = jax.jit(functools.partial(self_attention, embed_size=embed_size,
                                        heads=heads, tq=8, tk=8))
    out = attn_fn(value, key_in, query, params)
    out = jax.block_until_ready(out)

    ref = _reference(value, key_in, query, params,
                     embed_size=embed_size, heads=heads)
    # Tolerance covers bf16 MXU operands / bf16 context storage + EUP approx reciprocal.
    assert out.shape == ref.shape
    assert jnp.allclose(out, ref, atol=1e-2, rtol=1e-2), "mismatch vs reference"

    print("KERNEL_OK")
</pallas_src>

<mosaic_0001>
module attributes {stable_mosaic.version = 11 : i64} {
  func.func @_flash_attn_kernel(%arg0: i32, %arg1: i32, %arg2: i32, %arg3: i32, %arg4: memref<1x1x8x128xbf16, #tpu.memory_space<vmem>>, %arg5: memref<1x1x8x128xbf16, #tpu.memory_space<vmem>>, %arg6: memref<1x1x8x128xbf16, #tpu.memory_space<vmem>>, %arg7: memref<1x8x128xbf16, #tpu.memory_space<vmem>>, %arg8: memref<8x1xf32, #tpu.memory_space<vmem>>, %arg9: memref<8x1xf32, #tpu.memory_space<vmem>>, %arg10: memref<8x128xf32, #tpu.memory_space<vmem>>) attributes {dimension_semantics = [#tpu.dimension_semantics<parallel>, #tpu.dimension_semantics<parallel>, #tpu.dimension_semantics<parallel>, #tpu.dimension_semantics<arbitrary>], iteration_bounds = array<i64: 2, 4, 2, 2>, scalar_prefetch = 0 : i64, scratch_operands = 3 : i64, tpu.core_type = #tpu.core_type<tc>, window_params = [{transform_indices = @transform_0, window_bounds = array<i64: 1, 1, 8, 128>}, {transform_indices = @transform_1, window_bounds = array<i64: 1, 1, 8, 128>}, {transform_indices = @transform_2, window_bounds = array<i64: 1, 1, 8, 128>}, {transform_indices = @transform_3, window_bounds = array<i64: 1, 8, 128>}]} {
    %c0_i32 = arith.constant 0 : i32
    %0 = arith.cmpi eq, %arg3, %c0_i32 : i32
    %1 = arith.extui %0 : i1 to i32
    %c0_i32_0 = arith.constant 0 : i32
    %2 = arith.cmpi ne, %1, %c0_i32_0 : i32
    scf.if %2 {
      %cst_28 = arith.constant -1.000000e+30 : f32
      %36 = vector.broadcast %cst_28 : f32 to vector<8x1xf32>
      %c0_29 = arith.constant 0 : index
      %c0_30 = arith.constant 0 : index
      %37 = vector.load %arg8[%c0_29, %c0_30] : memref<8x1xf32, #tpu.memory_space<vmem>>, vector<8x1xf32>
      tpu.vector_store %arg8[%c0_29, %c0_30], %36 {strides = array<i32>} : memref<8x1xf32, #tpu.memory_space<vmem>>, vector<8x1xf32>,
      %cst_31 = arith.constant 0.000000e+00 : f32
      %38 = vector.broadcast %cst_31 : f32 to vector<8x1xf32>
      %c0_32 = arith.constant 0 : index
      %c0_33 = arith.constant 0 : index
      %39 = vector.load %arg9[%c0_32, %c0_33] : memref<8x1xf32, #tpu.memory_space<vmem>>, vector<8x1xf32>
      tpu.vector_store %arg9[%c0_32, %c0_33], %38 {strides = array<i32>} : memref<8x1xf32, #tpu.memory_space<vmem>>, vector<8x1xf32>,
      %cst_34 = arith.constant 0.000000e+00 : f32
      %40 = vector.broadcast %cst_34 : f32 to vector<8x128xf32>
      %c0_35 = arith.constant 0 : index
      %c0_36 = arith.constant 0 : index
      %41 = vector.load %arg10[%c0_35, %c0_36] : memref<8x128xf32, #tpu.memory_space<vmem>>, vector<8x128xf32>
      tpu.vector_store %arg10[%c0_35, %c0_36], %40 {strides = array<i32>} : memref<8x128xf32, #tpu.memory_space<vmem>>, vector<8x128xf32>,
    } else {
    }
    %c0 = arith.constant 0 : index
    %c0_1 = arith.constant 0 : index
    %c0_2 = arith.constant 0 : index
    %c0_3 = arith.constant 0 : index
    %3 = vector.load %arg4[%c0, %c0_1, %c0_2, %c0_3] : memref<1x1x8x128xbf16, #tpu.memory_space<vmem>>, vector<1x1x8x128xbf16>
    %4 = vector.shape_cast %3 : vector<1x1x8x128xbf16> to vector<8x128xbf16>
    %c0_4 = arith.constant 0 : index
    %c0_5 = arith.constant 0 : index
    %c0_6 = arith.constant 0 : index
    %c0_7 = arith.constant 0 : index
    %5 = vector.load %arg5[%c0_4, %c0_5, %c0_6, %c0_7] : memref<1x1x8x128xbf16, #tpu.memory_space<vmem>>, vector<1x1x8x128xbf16>
    %6 = vector.shape_cast %5 : vector<1x1x8x128xbf16> to vector<8x128xbf16>
    %c0_8 = arith.constant 0 : index
    %c0_9 = arith.constant 0 : index
    %c0_10 = arith.constant 0 : index
    %c0_11 = arith.constant 0 : index
    %7 = vector.load %arg6[%c0_8, %c0_9, %c0_10, %c0_11] : memref<1x1x8x128xbf16, #tpu.memory_space<vmem>>, vector<1x1x8x128xbf16>
    %8 = vector.shape_cast %7 : vector<1x1x8x128xbf16> to vector<8x128xbf16>
    %cst = arith.constant dense<0.000000e+00> : vector<8x8xf32>
    %9 = tpu.matmul %4, %6, %cst {dimension_numbers = #tpu.dot_dimension_numbers<[1], [1], [0], [0], [0, 0, 1, 0], [], []>} : vector<8x128xbf16>, vector<8x128xbf16>, vector<8x8xf32> -> vector<8x8xf32>
    %c0_12 = arith.constant 0 : index
    %c0_13 = arith.constant 0 : index
    %10 = vector.load %arg8[%c0_12, %c0_13] : memref<8x1xf32, #tpu.memory_space<vmem>>, vector<8x1xf32>
    %cst_14 = arith.constant dense<0xFF800000> : vector<8xf32>
    %11 = vector.multi_reduction <maximumf>, %9, %cst_14 [1] : vector<8x8xf32> to vector<8xf32>
    %12 = vector.shape_cast %11 : vector<8xf32> to vector<8x1xf32>
    %13 = arith.maximumf %10, %12 : vector<8x1xf32>
    %14 = arith.subf %10, %13 : vector<8x1xf32>
    %15 = math.exp %14 : vector<8x1xf32>
    %16 = vector.broadcast %13 : vector<8x1xf32> to vector<8x8xf32>
    %17 = arith.subf %9, %16 : vector<8x8xf32>
    %18 = math.exp %17 : vector<8x8xf32>
    %c0_15 = arith.constant 0 : index
    %c0_16 = arith.constant 0 : index
    %19 = vector.load %arg9[%c0_15, %c0_16] : memref<8x1xf32, #tpu.memory_space<vmem>>, vector<8x1xf32>
    %20 = arith.mulf %15, %19 : vector<8x1xf32>
    %cst_17 = arith.constant dense<0.000000e+00> : vector<8xf32>
    %21 = vector.multi_reduction <add>, %18, %cst_17 [1] : vector<8x8xf32> to vector<8xf32>
    %22 = vector.shape_cast %21 : vector<8xf32> to vector<8x1xf32>
    %23 = arith.addf %20, %22 : vector<8x1xf32>
    %c0_18 = arith.constant 0 : index
    %c0_19 = arith.constant 0 : index
    %24 = vector.load %arg9[%c0_18, %c0_19] : memref<8x1xf32, #tpu.memory_space<vmem>>, vector<8x1xf32>
    tpu.vector_store %arg9[%c0_18, %c0_19], %23 {strides = array<i32>} : memref<8x1xf32, #tpu.memory_space<vmem>>, vector<8x1xf32>,
    %c0_20 = arith.constant 0 : index
    %c0_21 = arith.constant 0 : index
    %25 = vector.load %arg10[%c0_20, %c0_21] : memref<8x128xf32, #tpu.memory_space<vmem>>, vector<8x128xf32>
    %26 = vector.broadcast %15 : vector<8x1xf32> to vector<8x128xf32>
    %27 = arith.mulf %26, %25 : vector<8x128xf32>
    %28 = arith.truncf %18 : vector<8x8xf32> to vector<8x8xbf16>
    %cst_22 = arith.constant dense<0.000000e+00> : vector<8x128xf32>
    %29 = tpu.matmul %28, %8, %cst_22 {dimension_numbers = #tpu.dot_dimension_numbers<[1], [0], [0], [1], [0, 0, 1, 1], [], []>} : vector<8x8xbf16>, vector<8x128xbf16>, vector<8x128xf32> -> vector<8x128xf32>
    %30 = arith.addf %27, %29 : vector<8x128xf32>
    %c0_23 = arith.constant 0 : index
    %c0_24 = arith.constant 0 : index
    %31 = vector.load %arg10[%c0_23, %c0_24] : memref<8x128xf32, #tpu.memory_space<vmem>>, vector<8x128xf32>
    tpu.vector_store %arg10[%c0_23, %c0_24], %30 {strides = array<i32>} : memref<8x128xf32, #tpu.memory_space<vmem>>, vector<8x128xf32>,
    %c0_25 = arith.constant 0 : index
    %c0_26 = arith.constant 0 : index
    %32 = vector.load %arg8[%c0_25, %c0_26] : memref<8x1xf32, #tpu.memory_space<vmem>>, vector<8x1xf32>
    tpu.vector_store %arg8[%c0_25, %c0_26], %13 {strides = array<i32>} : memref<8x1xf32, #tpu.memory_space<vmem>>, vector<8x1xf32>,
    %c1_i32 = arith.constant 1 : i32
    %33 = arith.cmpi eq, %arg3, %c1_i32 : i32
    %34 = arith.extui %33 : i1 to i32
    %c0_i32_27 = arith.constant 0 : i32
    %35 = arith.cmpi ne, %34, %c0_i32_27 : i32
    scf.if %35 {
      %c0_28 = arith.constant 0 : index
      %c0_29 = arith.constant 0 : index
      %36 = vector.load %arg9[%c0_28, %c0_29] : memref<8x1xf32, #tpu.memory_space<vmem>>, vector<8x1xf32>
      %37 = tpu.reciprocal %36 {approx = true} : vector<8x1xf32> -> vector<8x1xf32>
      %c0_30 = arith.constant 0 : index
      %c0_31 = arith.constant 0 : index
      %38 = vector.load %arg10[%c0_30, %c0_31] : memref<8x128xf32, #tpu.memory_space<vmem>>, vector<8x128xf32>
      %39 = vector.broadcast %37 : vector<8x1xf32> to vector<8x128xf32>
      %40 = arith.mulf %38, %39 : vector<8x128xf32>
      %41 = arith.truncf %40 : vector<8x128xf32> to vector<8x128xbf16>
      %c0_32 = arith.constant 0 : index
      %c0_33 = arith.constant 0 : index
      %c0_34 = arith.constant 0 : index
      %42 = vector.load %arg7[%c0_32, %c0_33, %c0_34] : memref<1x8x128xbf16, #tpu.memory_space<vmem>>, vector<1x8x128xbf16>
      %43 = vector.shape_cast %42 : vector<1x8x128xbf16> to vector<8x128xbf16>
      %44 = vector.shape_cast %41 : vector<8x128xbf16> to vector<1x8x128xbf16>
      tpu.vector_store %arg7[%c0_32, %c0_33, %c0_34], %44 {strides = array<i32>} : memref<1x8x128xbf16, #tpu.memory_space<vmem>>, vector<1x8x128xbf16>,
    } else {
    }
    return
  }
  func.func @transform_0(%arg0: i32, %arg1: i32, %arg2: i32, %arg3: i32) -> (i32, i32, i32, i32) {
    %c0_i32 = arith.constant 0 : i32
    %c0_i32_0 = arith.constant 0 : i32
    return %arg0, %arg1, %arg2, %c0_i32 : i32, i32, i32, i32
  }
  func.func @transform_1(%arg0: i32, %arg1: i32, %arg2: i32, %arg3: i32) -> (i32, i32, i32, i32) {
    %c0_i32 = arith.constant 0 : i32
    %c0_i32_0 = arith.constant 0 : i32
    return %arg0, %arg1, %arg3, %c0_i32 : i32, i32, i32, i32
  }
  func.func @transform_2(%arg0: i32, %arg1: i32, %arg2: i32, %arg3: i32) -> (i32, i32, i32, i32) {
    %c0_i32 = arith.constant 0 : i32
    %c0_i32_0 = arith.constant 0 : i32
    return %arg0, %arg1, %arg3, %c0_i32 : i32, i32, i32, i32
  }
  func.func @transform_3(%arg0: i32, %arg1: i32, %arg2: i32, %arg3: i32) -> (i32, i32, i32) {
    %c0_i32 = arith.constant 0 : i32
    return %arg0, %arg2, %arg1 : i32, i32, i32
  }
}

</mosaic_0001>

<bundles_post_ra>
// kernel: self_attention.1
= control target key start
LH: loop header
LB: loop body
LE: loop exit
PB: predicated region body
PF: predicated region fallthrough
CT: control target
= control target key end

     0   :  { %s797_s12 = smov 0   ;;  %s799_s13 = smov 0   ;;  %s928_s0 = inlined_call_operand.vmem [shape: bf16[2,4,16,128], index: 0, kind: input, shape index: {}]   ;;  %s929_s1 = inlined_call_operand.vmem [shape: bf16[2,4,16,128], index: 1, kind: input, shape index: {}]   ;;  %s930_s2 = inlined_call_operand.vmem [shape: bf16[2,4,16,128], index: 2, kind: input, shape index: {}]   ;;  %s931_s3 = inlined_call_operand.vmem [shape: bf16[2,16,512], index: 3, kind: output, shape index: {}]  }
   0x1   :  { %s801_s14 = smov 0   ;;  %s803_s15 = smov 0  }
   0x2   :  { %s805_s16 = smov 0   ;;  %s807_s17 = smov 0  }
   0x3   :  { %s809_s18 = smov 0   ;;  %s811_s19 = smov 0  }
   0x4   :  { %s813_s20 = smov 0  }
   0x5 LB: > { %s28_s21 = sadd.s32 1, %s755_s16  ;;  %s31_s22 = sadd.s32 1, %s759_s17  ;;  %s771_s20 = sphi %s813_s20, %s13_s20   ;;  %s767_s19 = sphi %s811_s19, %s945_s19   ;;  %s763_s18 = sphi %s809_s18, %s944_s18   ;;  %s759_s17 = sphi %s807_s17, %s943_s17   ;;  %s755_s16 = sphi %s805_s16, %s942_s16   ;;  %s751_s15 = sphi %s803_s15, %s941_s15   ;;  %s747_s14 = sphi %s801_s14, %s940_s14   ;;  %s743_s13 = sphi %s799_s13, %s939_s13   ;;  %s739_s12 = sphi %s797_s12, %s938_s12  }
   0x6   : > { %p29_p0 = scmp.ge.s32.totalorder %s28_s21, 2  ;;  %p598_p1 = scmp.ge.s32.totalorder %s771_s20, 1 }
   0x7   : > { %p220_p2 = scmp.lt.s32.totalorder %s771_s20, 33  ;;  %s35_s23 = sadd.s32 1, %s763_s18 }
   0x8   : > { %s947_s21 = smov (%p29_p0, %s28_s21), 0  ;;  %s949_s22 = smov (!%p29_p0, %s31_s22), %s759_s17 }
   0x9   : > { %p33_p3 = scmp.ge.s32.totalorder %s949_s22, 2  ;;  %p221_p4 = pnand %p598_p1, %p220_p2 }
   0xa   : > { %s39_s24 = sadd.s32 1, %s767_s19  ;;  %p282_p7 = scmp.lt.s32.totalorder (!%p221_p4), %s751_s15, 1 }
   0xb   : > { %s951_s22 = smov (%p33_p3, %s949_s22), 0  ;;  %s953_s23 = smov (!%p33_p3, %s35_s23), %s763_s18 }
   0xc   : > { %932 = sst [smem:[#allocation5_spill]] %s951_s22  ;;  %p37_p5 = scmp.ge.s32.totalorder %s953_s23, 4 }
   0xd   : > { %p284_p8 = scmp.lt.s32.totalorder (!%p221_p4), %s747_s14, 3  ;;  %p286_p9 = scmp.lt.s32.totalorder (!%p221_p4), %s743_s13, 1 }
   0xe   : > { %s955_s23 = smov (%p37_p5, %s953_s23), 0  ;;  %s957_s24 = smov (!%p37_p5, %s39_s24), %s767_s19 }
   0xf   : > { %933 = sst [smem:[#allocation6_spill]] %s955_s23  ;;  %p41_p6 = scmp.ge.s32.totalorder %s957_s24, 2 }
  0x10   : > { %224 = sbr.rel (%p221_p4) target bundleno = 681 (0x2a9), region = 32  ;;  %p298_p10 = scmp.lt.s32.totalorder (!%p221_p4), %s739_s12, 1 }
  0x11   : > { %s959_s24 = smov (%p41_p6, %s957_s24), 0  ;;  %p611_p11 = scmp.ne.s32.totalorder (!%p221_p4), %s739_s12, 0 }
  0x12   : > { %934 = sst [smem:[#allocation7_spill]] %s959_s24 }
  0x15   : > { %s961_s15 = smov (!%p282_p7, %s751_s15), 1  ;;  %s963_s14 = smov (!%p284_p8, %s747_s14), 3 }
  0x16   : > { %s965_s13 = smov (!%p286_p9, %s743_s13), 1  ;;  %s599_s25 = sshll.u32 %s963_s14, 1 }
  0x17   : > { %s600_s26 = sshll.u32 %s961_s15, 3  ;;  %s289_s27 = sadd.s32 %s599_s25, %s965_s13 }
  0x18   : > { %s608_s28 = sshll.u32 %s965_s13, 2  ;;  %s291_s29 = sadd.s32 %s600_s26, %s289_s27 }
  0x19   : > { %s325_s30 = sadd.s32 %s608_s28, %s963_s14  ;;  %s601_s4 = sshll.u32 %s291_s29, 2 }
  0x1a   : > { %s327_s5 = sadd.s32 %s600_s26, %s325_s30  ;;  %s293_s8 = scalar_lea.vmem %s928_s0, %s601_s4 }
  0x1b   : > { %s865_s9 = sshll.u32 %s327_s5, 2 }
  0x1c   : > { %s299_s10 = scalar_select %p298_p10, %s739_s12, 1 }
  0x1d   : > { %s329_s23 = scalar_lea.vmem %s931_s3, %s865_s9  ;;  %334 = sbr.rel (%p611_p11) target bundleno = 38 (0x26), region = 36 }
  0x1e   : > { %s301_s15 = sadd.s32 %s599_s25, %s299_s10 }
  0x1f   : > { %s303_s22 = sadd.s32 %s600_s26, %s301_s15 }
  0x20   : > { %s874_s13 = sshll.u32 %s303_s22, 2 }
  0x21   : > { %s305_s28 = scalar_lea.vmem %s929_s1, %s874_s13  ;;  %s317_s4 = scalar_lea.vmem %s930_s2, %s874_s13 }
  0x22   : > { %vm335_vm0 = vcmask 7168   ;;  %v773_v0 = vmov -1e+30   ;;  %v774_v1 = vmov 0.0  }
  0x23   : > { %336 = vst.msk [vmem:[#allocation2] sm:$0xff] %vm335_vm0, %v773_v0 }
  0x24   : > { %337 = vst.msk [vmem:[#allocation3] sm:$0xff] %vm335_vm0, %v774_v1 }
  0x25   : > { %338 = vst [vmem:[#allocation4] sm:$0xff] %v774_v1 }
  0x26 PF: > { %v340_v2 = vld [vmem:[%s305_s28] sm:$0xf]  ;;  %vm356_vm1 = vcmask 64512   ;;  %v775_v7 = vmov 0   ;;  %vm378_vm2 = vcmask 7168   ;;  %vm391_vm3 = vcmask 1043456  }
  0x27   : > { %349 = vmatpush.bf16.xpose.msra.mxu0 %v340_v2  ;;  %v339_v3 = vld [vmem:[%s293_s8] sm:$0xf]  ;;  %692 = vset.pattern.permute.xlu0 %v775_v7  ;;  %p613_p12 = scmp.ne.s32.totalorder %s739_s12, 1 }
  0x28   : > { %693 = vset.pattern.permute.xlu1 %v775_v7  ;;  %v341_v14 = vld [vmem:[%s317_s4] sm:$0xf] }
  0x29   : > { %v393_v15 = vsel %vm391_vm3, %v341_v14, 0 }
  0x2a   : > { %v355_v8 = vld [vmem:[#allocation2] sm:$0xff]  ;;  %402 = vmatpush.bf16.msra.mxu1 %v393_v15 }
  0x2b   : > { %v372_v23 = vld [vmem:[#allocation3] sm:$0xff] }
  0x2c   : > { %v380_v27 = vld [vmem:[#allocation4] sm:$0xff] }
  0x2e   : > { %350 = vmatmul.bf16.vlgmr.msra.gmra.mxu0 %v339_v3 }
  0xab   : > { %v351_v4 = vpop.f32.mrf.mxu0 }
  0xac   : > { %v357_v5 = vsel %vm356_vm1, %v351_v4, -inf }
  0xad   : > { %358 = vmax.xlane.f32.xlu0 %v357_v5 }
  0xb3   : > { %v353_v6 = vpop.f32.mrf.mxu0 }
 0x120   : > { %v359_v9 = vpop.xlane.xlu0 %358 }
 0x121   : > { %v360_v10 = vmax.f32 %v355_v8, %v359_v9 }
 0x123   : > { %v361_v11 = vsub.f32 %v355_v8, %v360_v10  ;;  %410 = vst.msk [vmem:[#allocation2] sm:$0xff] %vm378_vm2, %v360_v10  ;;  %366 = vperm.xlu0 %692, %v360_v10  }
 0x125   : > { %v362_v12 = vmul.f32 1.442695, %v361_v11 }
 0x127   : > { %694 = vpow2.f32 %v362_v12 }
 0x12d   : > { %v695_v13 = vpop.eup %694 }
 0x12e   : > { %383 = vperm.xlu1 %693, %v695_v13   ;;  %v373_v24 = vmul.f32 %v695_v13, %v372_v23 }
 0x195   : > { %v367_v16 = vpop.permute.xlu0 %366 }
 0x196   : > { %v369_v17 = vsub.f32 %v351_v4, %v367_v16 }
 0x198   : > { %v370_v18 = vmul.f32 1.442695, %v369_v17 }
 0x19a   : > { %696 = vpow2.f32 %v370_v18 }
 0x1a0   : > { %v697_v19 = vpop.eup %696  ;;  %v384_v22 = vpop.permute.xlu1 %383 }
 0x1a1   : > { %v374_v20 = vsel %vm356_vm1, %v697_v19, 0.0  ;;  %v387_v21 = vpack.c.bf16 %v697_v19, %v697_v19  ;;  %v386_v28 = vmul.f32 %v384_v22, %v380_v27 }
 0x1a2   : > { %375 = vadd.xlane.f32.xlu1 %v374_v20 }
 0x1a3   : > { %612 = vmatmul.msk.bf16.vlgmr.msra.gmra.mxu1 %vm356_vm1, %v387_v21 }
 0x215   : > { %v376_v25 = vpop.xlane.xlu1 %375 }
 0x216   : > { %v377_v26 = vadd.f32 %v376_v25, %v373_v24 }
 0x218   : > { %379 = vst.msk [vmem:[#allocation3] sm:$0xff] %vm378_vm2, %v377_v26 }
 0x220   : > { %v404_v29 = vpop.f32.mrf.mxu1 }
 0x221   : > { %v408_v30 = vadd.f32 %v404_v29, %v386_v28 }
 0x223   : > { %409 = vst [vmem:[#allocation4] sm:$0xff] %v408_v30 }
 0x224   : > { %414 = sbr.rel (%p613_p12) target bundleno = 681 (0x2a9), region = 40 }
 0x228   : > { %v406_v31 = vpop.f32.mrf.mxu1 }
 0x229   : > { %v415_v32 = vld [vmem:[#allocation3] sm:$0xff]  ;;  %v776_v33 = vmov 0  }
 0x22a   : > { %698 = vset.pattern.permute.xlu0 %v776_v33  ;;  %699 = vrcp.f32 %v415_v32  ;;  %v417_v35 = vld [vmem:[#allocation4] sm:$0xff] }
 0x230   : > { %v700_v34 = vpop.eup %699 }
 0x231   : > { %420 = vperm.xlu0 %698, %v700_v34  }
 0x2a3   : > { %v421_v36 = vpop.permute.xlu0 %420 }
 0x2a4   : > { %v423_v37 = vmul.f32 %v421_v36, %v417_v35 }
 0x2a6   : > { %v424_v38 = vpack.c.bf16 %v423_v37, %v423_v37 }
 0x2a8   : > { %425 = vst [vmem:[%s329_s23] sm:$0xf] %v424_v38 }
 0x2a9 PF: > { %s13_s20 = sadd.s32 1, %s771_s20   ;;  %s935_s5 = sld [smem:[#allocation5_spill]] }
 0x2aa   : > { %p10_p13 = scmp.ge.s32.totalorder %s13_s20, 34   ;;  %s936_s6 = sld [smem:[#allocation6_spill]] }
 0x2ab   : > { %s937_s7 = sld [smem:[#allocation7_spill]]  ;;  %s938_s12 = smov %s755_s16 }
 0x2ac   : > { %s939_s13 = smov %s759_s17  ;;  %s940_s14 = smov %s763_s18 }
 0x2ad   : > { %s941_s15 = smov %s767_s19  ;;  %s942_s16 = smov %s947_s21 }
 0x2ae   :  { %12 = sbr.rel (!%p10_p13) target bundleno = 5 (0x5), region = 76 }
 0x2af   : > { %s943_s17 = smov %s935_s5 }
 0x2b0   : > { %s944_s18 = smov %s936_s6 }
 0x2b1   : > { %s945_s19 = smov %s937_s7 }

</bundles_post_ra>
